<compile_context>
chip_gen: v7x
topology: tpu7x:2x2x1
jax: 0.10.0
libtpu: 0.0.40
codegen_flags: <defaults>
</compile_context>

<pallas_src>
import functools

import jax
import jax.numpy as jnp
from jax import lax
from jax.experimental import pallas as pl
from jax.experimental.pallas import tpu as pltpu

_LANES = 128
_CHUNK_ROWS = 128            # inner-loop chunk: temps are (64,128) = 8 vregs each
_TWO_PI = 6.283185307179586


def _cdiv(a, b):
    return -(-a // b)


def _round_up(v, m):
    return _cdiv(v, m) * m


def _mix32(x):
    """lowbias32: bijective uint32 mixer, well scrambled on sequential counters."""
    x = x ^ (x >> jnp.uint32(16))
    x = x * jnp.uint32(0x7FEB352D)
    x = x ^ (x >> jnp.uint32(15))
    x = x * jnp.uint32(0x846CA68B)
    x = x ^ (x >> jnp.uint32(16))
    return x


def _premix_seed(seed):
    """Host-side (outside-kernel) seed scrambling -> shape (1,) int32 for SMEM."""
    s = jnp.asarray(seed, dtype=jnp.int32).reshape(())
    s = lax.bitcast_convert_type(s * jnp.int32(-1640531527), jnp.uint32)  # * 0x9E3779B9
    s = _mix32(s)
    return lax.bitcast_convert_type(s, jnp.int32).reshape((1,))


def _default_block_rows():
    """Per-generation default block size (rows of 128 lanes)."""
    try:
        kind = jax.devices()[0].device_kind.lower().replace(" ", "")
    except Exception:  # pragma: no cover
        kind = ""
    if "v7" in kind or "tpu7" in kind:
        # v7x: 3.2 TB/s HBM -> 4 MiB f32 blocks amortize the ~0.35us/step cost;
        # 4 MiB x 2 buffers x (in+out) = 16 MiB, inside the 32 MiB scoped-VMEM
        # default and well under the 64 MiB physical VMEM.
        return 8192
    # v5e (16 MiB scoped-VMEM default) and v6e: 2 MiB blocks -> ~90% step
    # efficiency with only 8 MiB of double-buffered in+out resident.
    return 4096


def _gaussian_noise_kernel(seed_ref, x_ref, o_ref, *, std):
    block_rows, lanes = x_ref.shape
    chunk = min(_CHUNK_ROWS, block_rows)   # rows produced per inner-loop step
    half = chunk // 2                      # rows of Box-Muller pairs per step
    n_chunks = block_rows // chunk         # wrapper guarantees exact division

    # Scalar work (SMEM/sreg): fold grid position + pre-mixed seed into the
    # counter stream so every block / TensorCore draws distinct noise.
    pid = pl.program_id(0)
    block_off = pid * jnp.int32(n_chunks * half * lanes) + seed_ref[0]

    # Loop-invariant per-pair counter pattern, hoisted out of the chunk loop
    # (JAX does not CSE broadcast/iota inside loops).
    row_ids = lax.broadcasted_iota(jnp.int32, (half, lanes), 0)
    col_ids = lax.broadcasted_iota(jnp.int32, (half, lanes), 1)
    pair0 = row_ids * jnp.int32(lanes) + col_ids

    std_f = jnp.float32(std)
    exp_one = jnp.uint32(0x3F800000)       # exponent bits of 1.0f

    def body(c, carry):
        r0 = pl.multiple_of(c * chunk, chunk)
        r1 = pl.multiple_of(r0 + half, half)

        # One 32-bit counter hash per Box-Muller pair (int32 adds wrap the
        # same as uint32); its two 16-bit halves become the two uniforms via
        # the exponent trick: floats in [1, 2) with 16-bit resolution.
        ctr = pair0 + (block_off + c * jnp.int32(half * lanes))
        bits = _mix32(lax.bitcast_convert_type(ctr, jnp.uint32))
        f1 = lax.bitcast_convert_type(
            ((bits >> jnp.uint32(16)) << jnp.uint32(7)) | exp_one, jnp.float32)
        f2 = lax.bitcast_convert_type(
            ((bits & jnp.uint32(0xFFFF)) << jnp.uint32(7)) | exp_one, jnp.float32)
        u1 = jnp.float32(2.0) - f1         # (0, 1]  -> log-safe
        u2 = f2 - jnp.float32(1.0)         # [0, 1)

        # Box-Muller using BOTH outputs; the second transcendental (sin) is
        # replaced by sign(0.5 - u2) * sqrt(1 - cos^2) -> one sqrt instead of
        # a full sin range reduction on the single EUP port.
        r = jnp.sqrt(jnp.float32(-2.0) * jnp.log(u1)) * std_f
        cz = jnp.cos(jnp.float32(_TWO_PI) * u2)
        sz = jnp.sqrt(jnp.maximum(jnp.float32(1.0) - cz * cz, jnp.float32(0.0)))
        sz = jnp.where(u2 < jnp.float32(0.5), sz, -sz)

        o_ref[pl.ds(r0, half), :] = (
            x_ref[pl.ds(r0, half), :].astype(jnp.float32) + r * cz
        ).astype(o_ref.dtype)
        o_ref[pl.ds(r1, half), :] = (
            x_ref[pl.ds(r1, half), :].astype(jnp.float32) + r * sz
        ).astype(o_ref.dtype)
        return carry

    if n_chunks == 1:
        body(jnp.int32(0), 0)
    else:
        # unroll=2 keeps two independent chunks in flight for the scheduler
        # while the live temporaries (a handful of (64,128) values, 8 vregs
        # each) stay inside the 64-entry vreg file -- no VMEM staging.
        lax.fori_loop(0, n_chunks, body, 0, unroll=2)


def gaussian_noise(x, seed, *, mean=0.0, std=1.0, training=True,
                   block_rows=None, donate_x=False):
    """Pallas implementation of GaussianNoise.forward.

    `mean` is stored by the PyTorch module but unused in forward() (noise is
    always drawn with mean=0); kept for API parity.  `seed` makes the draw
    explicit/reproducible (PyTorch uses the implicit global RNG state).
    Noise is reproducible per (seed, shape, block configuration).
    """
    del mean  # unused in the PyTorch forward, kept for API parity
    if not training:
        return x

    orig_shape = x.shape
    orig_dtype = x.dtype
    n = x.size

    flat = x.reshape(-1)
    # Pad only to an even number of 128-lane rows (<= 255 elements).  Typical
    # GAN feature maps (numel % 256 == 0) take this copy-free path; ragged
    # sizes still pay one pad/slice copy.
    pad = (-n) % (2 * _LANES)
    if pad:
        flat = jnp.pad(flat, (0, pad))
    rows = flat.shape[0] // _LANES
    x2d = flat.reshape(rows, _LANES)

    if block_rows is None:
        if rows <= _CHUNK_ROWS:
            block_rows = rows              # single full-extent block
        else:
            target = _default_block_rows()
            # Keep >= ~8 grid steps on mid-size inputs so the DMA pipeline has
            # steps to overlap and v7x megacore can feed both TensorCores.
            target = min(target, _round_up(_cdiv(rows, 8), _CHUNK_ROWS))
            block_rows = max(_CHUNK_ROWS, target)
    else:
        block_rows = min(int(block_rows), rows)

    chunk = min(_CHUNK_ROWS, block_rows)
    assert chunk % 2 == 0 and block_rows % chunk == 0, block_rows
    assert block_rows % 8 == 0 or block_rows == rows, block_rows

    # Partial final block (rows not a multiple of block_rows) is masked by the
    # Pallas pipeline: padded reads, out-of-range writes discarded.
    num_blocks = _cdiv(rows, block_rows)
    seed_arr = _premix_seed(seed)

    out2d = pl.pallas_call(
        functools.partial(_gaussian_noise_kernel, std=float(std)),
        out_shape=jax.ShapeDtypeStruct((rows, _LANES), orig_dtype),
        grid_spec=pltpu.PrefetchScalarGridSpec(
            num_scalar_prefetch=1,         # seed lands in SMEM once, before the grid
            grid=(num_blocks,),
            in_specs=[pl.BlockSpec((block_rows, _LANES), lambda i, s: (i, 0))],
            out_specs=pl.BlockSpec((block_rows, _LANES), lambda i, s: (i, 0)),
        ),
        compiler_params=pltpu.CompilerParams(
            dimension_semantics=("parallel",)),
        # Alias x -> out only when the caller actually donates x; otherwise XLA
        # would insert a defensive copy.
        input_output_aliases=({1: 0} if donate_x else {}),
    )(seed_arr, x2d)

    out = out2d
    if pad:
        out = out.reshape(-1)[:n]
    return out.reshape(orig_shape)


if __name__ == "__main__":
    key = jax.random.PRNGKey(0)
    std = 0.5

    # Primary example: NCHW GAN feature map (N=2, C=4, H=16, W=16).
    x = jax.random.normal(key, (2, 4, 16, 16), dtype=jnp.float32)
    y = jax.block_until_ready(
        gaussian_noise(x, seed=1234, mean=0.0, std=std, training=True))
    assert y.shape == x.shape and y.dtype == x.dtype
    noise = y - x
    assert bool(jnp.all(jnp.isfinite(noise)))
    assert abs(float(jnp.mean(noise))) < 0.1, float(jnp.mean(noise))
    assert abs(float(jnp.std(noise)) - std) < 0.1, float(jnp.std(noise))

    # Deterministic for a fixed seed; different seed -> different noise.
    y2 = jax.block_until_ready(gaussian_noise(x, seed=1234, std=std))
    assert bool(jnp.all(y2 == y))
    y3 = jax.block_until_ready(gaussian_noise(x, seed=4321, std=std))
    assert not bool(jnp.all(y3 == y))

    k1, k2, k3, k4 = jax.random.split(key, 4)

    # Multi-block row grid: blocks must not repeat noise.
    xg = jax.random.normal(k1, (2, 4, 32, 32), dtype=jnp.float32)      # 64 rows
    yg = jax.block_until_ready(gaussian_noise(xg, seed=7, std=std, block_rows=16))
    ng = (yg - xg).reshape(-1, 16 * _LANES)
    assert bool(jnp.all(jnp.isfinite(ng)))
    assert abs(float(jnp.std(ng)) - std) < 0.1
    assert not bool(jnp.all(ng[0] == ng[1]))

    # Chunked inner-loop path (block_rows > _CHUNK_ROWS) across 2 grid blocks.
    xc = jax.random.normal(k2, (2, 8, 64, 128), dtype=jnp.float32)     # 1024 rows
    yc = jax.block_until_ready(gaussian_noise(xc, seed=11, std=std, block_rows=512))
    nc = yc - xc
    assert bool(jnp.all(jnp.isfinite(nc)))
    assert abs(float(jnp.mean(nc))) < 0.05
    assert abs(float(jnp.std(nc)) - std) < 0.05

    # Partial final block (rows not a multiple of the auto block size).
    xp = jax.random.normal(k3, (2, 4, 40, 128), dtype=jnp.float32)     # 320 rows
    yp = jax.block_until_ready(gaussian_noise(xp, seed=3, std=std))
    npart = yp - xp
    assert yp.shape == xp.shape
    assert bool(jnp.all(jnp.isfinite(npart)))
    assert abs(float(jnp.std(npart)) - std) < 0.05

    # Ragged size exercises the (rare) pad/slice path.
    xr = jax.random.normal(k4, (3, 5, 7, 11), dtype=jnp.float32)       # 1155 elems
    yr = jax.block_until_ready(gaussian_noise(xr, seed=99, std=std))
    assert yr.shape == xr.shape and bool(jnp.all(jnp.isfinite(yr - xr)))

    # bf16 input: dtype preserved, stats still sane.
    xb = jax.random.normal(key, (2, 4, 16, 16), dtype=jnp.bfloat16)
    yb = jax.block_until_ready(gaussian_noise(xb, seed=5, std=std))
    assert yb.dtype == jnp.bfloat16 and yb.shape == xb.shape
    nb = yb.astype(jnp.float32) - xb.astype(jnp.float32)
    assert bool(jnp.all(jnp.isfinite(nb)))
    assert abs(float(jnp.std(nb)) - std) < 0.15

    # Eval mode is the identity.
    y_eval = gaussian_noise(x, seed=1234, std=std, training=False)
    assert bool(jnp.all(y_eval == x))

    print("KERNEL_OK")
</pallas_src>

<mosaic_0001>
module attributes {stable_mosaic.version = 11 : i64} {
  func.func @_gaussian_noise_kernel(%arg0: i32, %arg1: memref<1xi32, #tpu.memory_space<smem>>, %arg2: memref<16x128xf32, #tpu.memory_space<vmem>>, %arg3: memref<16x128xf32, #tpu.memory_space<vmem>>) attributes {dimension_semantics = [#tpu.dimension_semantics<parallel>], iteration_bounds = array<i64: 1>, scalar_prefetch = 1 : i64, scratch_operands = 0 : i64, tpu.core_type = #tpu.core_type<tc>, window_params = [{transform_indices = @transform_0, window_bounds = array<i64: 16, 128>}, {transform_indices = @transform_1, window_bounds = array<i64: 16, 128>}]} {
    %c1024_i32 = arith.constant 1024 : i32
    %0 = arith.muli %arg0, %c1024_i32 : i32
    %c0 = arith.constant 0 : index
    %1 = memref.load %arg1[%c0] : memref<1xi32, #tpu.memory_space<smem>>
    %2 = arith.addi %0, %1 : i32
    %3 = tpu.iota {dimensions = array<i32: 0>} : vector<8x128xi32>
    %4 = tpu.iota {dimensions = array<i32: 1>} : vector<8x128xi32>
    %c128_i32 = arith.constant 128 : i32
    %5 = vector.broadcast %c128_i32 : i32 to vector<8x128xi32>
    %6 = arith.muli %3, %5 : vector<8x128xi32>
    %7 = arith.addi %6, %4 : vector<8x128xi32>
    %c0_i32 = arith.constant 0 : i32
    %c16_i32 = arith.constant 16 : i32
    %8 = arith.muli %c0_i32, %c16_i32 : i32
    %9 = tpu.assume_multiple %8, 16 : i32
    %c8_i32 = arith.constant 8 : i32
    %10 = arith.addi %9, %c8_i32 : i32
    %11 = tpu.assume_multiple %10, 8 : i32
    %c0_i32_0 = arith.constant 0 : i32
    %c1024_i32_1 = arith.constant 1024 : i32
    %12 = arith.muli %c0_i32_0, %c1024_i32_1 : i32
    %13 = arith.addi %2, %12 : i32
    %14 = vector.broadcast %13 : i32 to vector<8x128xi32>
    %15 = arith.addi %7, %14 : vector<8x128xi32>
    %16 = tpu.bitcast %15 : vector<8x128xi32> -> vector<8x128xi32>
    %c16_i32_2 = arith.constant 16 : i32
    %17 = vector.broadcast %c16_i32_2 : i32 to vector<8x128xi32>
    %18 = arith.shrui %16, %17 : vector<8x128xi32>
    %19 = arith.xori %16, %18 : vector<8x128xi32>
    %c2146121005_i32 = arith.constant 2146121005 : i32
    %20 = vector.broadcast %c2146121005_i32 : i32 to vector<8x128xi32>
    %21 = arith.muli %19, %20 : vector<8x128xi32>
    %c15_i32 = arith.constant 15 : i32
    %22 = vector.broadcast %c15_i32 : i32 to vector<8x128xi32>
    %23 = arith.shrui %21, %22 : vector<8x128xi32>
    %24 = arith.xori %21, %23 : vector<8x128xi32>
    %c-2073254261_i32 = arith.constant -2073254261 : i32
    %25 = vector.broadcast %c-2073254261_i32 : i32 to vector<8x128xi32>
    %26 = arith.muli %24, %25 : vector<8x128xi32>
    %c16_i32_3 = arith.constant 16 : i32
    %27 = vector.broadcast %c16_i32_3 : i32 to vector<8x128xi32>
    %28 = arith.shrui %26, %27 : vector<8x128xi32>
    %29 = arith.xori %26, %28 : vector<8x128xi32>
    %c16_i32_4 = arith.constant 16 : i32
    %30 = vector.broadcast %c16_i32_4 : i32 to vector<8x128xi32>
    %31 = arith.shrui %29, %30 : vector<8x128xi32>
    %c7_i32 = arith.constant 7 : i32
    %32 = vector.broadcast %c7_i32 : i32 to vector<8x128xi32>
    %33 = arith.shli %31, %32 : vector<8x128xi32>
    %c1065353216_i32 = arith.constant 1065353216 : i32
    %34 = vector.broadcast %c1065353216_i32 : i32 to vector<8x128xi32>
    %35 = arith.ori %33, %34 : vector<8x128xi32>
    %36 = tpu.bitcast %35 : vector<8x128xi32> -> vector<8x128xf32>
    %c65535_i32 = arith.constant 65535 : i32
    %37 = vector.broadcast %c65535_i32 : i32 to vector<8x128xi32>
    %38 = arith.andi %29, %37 : vector<8x128xi32>
    %c7_i32_5 = arith.constant 7 : i32
    %39 = vector.broadcast %c7_i32_5 : i32 to vector<8x128xi32>
    %40 = arith.shli %38, %39 : vector<8x128xi32>
    %c1065353216_i32_6 = arith.constant 1065353216 : i32
    %41 = vector.broadcast %c1065353216_i32_6 : i32 to vector<8x128xi32>
    %42 = arith.ori %40, %41 : vector<8x128xi32>
    %43 = tpu.bitcast %42 : vector<8x128xi32> -> vector<8x128xf32>
    %cst = arith.constant 2.000000e+00 : f32
    %44 = vector.broadcast %cst : f32 to vector<8x128xf32>
    %45 = arith.subf %44, %36 : vector<8x128xf32>
    %cst_7 = arith.constant 1.000000e+00 : f32
    %46 = vector.broadcast %cst_7 : f32 to vector<8x128xf32>
    %47 = arith.subf %43, %46 : vector<8x128xf32>
    %48 = math.log %45 : vector<8x128xf32>
    %cst_8 = arith.constant -2.000000e+00 : f32
    %49 = vector.broadcast %cst_8 : f32 to vector<8x128xf32>
    %50 = arith.mulf %49, %48 : vector<8x128xf32>
    %51 = math.sqrt %50 : vector<8x128xf32>
    %cst_9 = arith.constant 5.000000e-01 : f32
    %52 = vector.broadcast %cst_9 : f32 to vector<8x128xf32>
    %53 = arith.mulf %51, %52 : vector<8x128xf32>
    %cst_10 = arith.constant 6.28318548 : f32
    %54 = vector.broadcast %cst_10 : f32 to vector<8x128xf32>
    %55 = arith.mulf %54, %47 : vector<8x128xf32>
    %56 = math.cos %55 : vector<8x128xf32>
    %57 = arith.mulf %56, %56 : vector<8x128xf32>
    %cst_11 = arith.constant 1.000000e+00 : f32
    %58 = vector.broadcast %cst_11 : f32 to vector<8x128xf32>
    %59 = arith.subf %58, %57 : vector<8x128xf32>
    %cst_12 = arith.constant 0.000000e+00 : f32
    %60 = vector.broadcast %cst_12 : f32 to vector<8x128xf32>
    %61 = arith.maximumf %59, %60 : vector<8x128xf32>
    %62 = math.sqrt %61 : vector<8x128xf32>
    %cst_13 = arith.constant 5.000000e-01 : f32
    %63 = vector.broadcast %cst_13 : f32 to vector<8x128xf32>
    %64 = arith.cmpf olt, %47, %63 : vector<8x128xf32>
    %cst_14 = arith.constant 0.000000e+00 : f32
    %65 = vector.broadcast %cst_14 : f32 to vector<8x128xf32>
    %66 = arith.subf %65, %62 : vector<8x128xf32>
    %67 = arith.select %64, %62, %66 : vector<8x128xi1>, vector<8x128xf32>
    %68 = arith.index_cast %9 : i32 to index
    %c0_15 = arith.constant 0 : index
    %69 = vector.load %arg2[%68, %c0_15] : memref<16x128xf32, #tpu.memory_space<vmem>>, vector<8x128xf32>
    %70 = arith.mulf %53, %56 : vector<8x128xf32>
    %71 = arith.addf %69, %70 : vector<8x128xf32>
    %72 = arith.index_cast %9 : i32 to index
    %c0_16 = arith.constant 0 : index
    %73 = vector.load %arg3[%72, %c0_16] : memref<16x128xf32, #tpu.memory_space<vmem>>, vector<8x128xf32>
    tpu.vector_store %arg3[%72, %c0_16], %71 {strides = array<i32>} : memref<16x128xf32, #tpu.memory_space<vmem>>, vector<8x128xf32>,
    %74 = arith.index_cast %11 : i32 to index
    %c0_17 = arith.constant 0 : index
    %75 = vector.load %arg2[%74, %c0_17] : memref<16x128xf32, #tpu.memory_space<vmem>>, vector<8x128xf32>
    %76 = arith.mulf %53, %67 : vector<8x128xf32>
    %77 = arith.addf %75, %76 : vector<8x128xf32>
    %78 = arith.index_cast %11 : i32 to index
    %c0_18 = arith.constant 0 : index
    %79 = vector.load %arg3[%78, %c0_18] : memref<16x128xf32, #tpu.memory_space<vmem>>, vector<8x128xf32>
    tpu.vector_store %arg3[%78, %c0_18], %77 {strides = array<i32>} : memref<16x128xf32, #tpu.memory_space<vmem>>, vector<8x128xf32>,
    return
  }
  func.func @transform_0(%arg0: i32, %arg1: memref<1xi32, #tpu.memory_space<smem>>) -> (i32, i32) {
    %c0_i32 = arith.constant 0 : i32
    %c0_i32_0 = arith.constant 0 : i32
    return %arg0, %c0_i32 : i32, i32
  }
  func.func @transform_1(%arg0: i32, %arg1: memref<1xi32, #tpu.memory_space<smem>>) -> (i32, i32) {
    %c0_i32 = arith.constant 0 : i32
    %c0_i32_0 = arith.constant 0 : i32
    return %arg0, %c0_i32 : i32, i32
  }
}

</mosaic_0001>

<bundles_post_ra>
// kernel: tpu_custom_call.1
= control target key start
LH: loop header
LB: loop body
LE: loop exit
PB: predicated region body
PF: predicated region fallthrough
CT: control target
= control target key end

     0   :  { %8 = vsyncpa [#allocation5], 0  ;;  %s372_s0 = inlined_call_operand.<no memory space> [shape: s32[1], index: 0, kind: input, shape index: {}]   ;;  %s373_s1 = inlined_call_operand.hbm [shape: f32[16,128], index: 1, kind: input, shape index: {}]   ;;  %s374_s2 = inlined_call_operand.hbm [shape: f32[16,128], index: 2, kind: output, shape index: {}]  }
   0x1   :  { %9 = vsyncpa [#allocation6], 0  ;;  %s289_s9 = smov [#allocation4]   ;;  %s241_s13 = scalar_lea.hbm %s373_s1, 256 }
   0x2   :  { %s15_s10 = sshll.u32 %s289_s9, 4  ;;  %p242_p0 = scmp.ne.s32.totalorder %s373_s1, %s241_s13  ;;  %s16_s10 = int_to_ptr.vmem [resolvable:$true] %s15_s10 }
   0x3   :  { %p245_p1 = scmp.lt.u32.totalorder %s241_s13, %s373_s1 }
   0x5   :  { %p247_p2 = pnand %p245_p1, %p242_p0 }
   0x7   :  { %250 = shalt.err (!%p247_p2)
}
   0x8   :  { %s251_s18 = scalar_lea.vmem %s16_s10, 256  ;;  %p256_p4 = scmp.lt.s32.totalorder %s16_s10, %s16_s10 }
   0x9   :  { %p252_p3 = scmp.ne.s32.totalorder %s16_s10, %s251_s18  ;;  %p257_p5 = scmp.lt.s32.totalorder %s251_s18, %s251_s18 }
   0xb   :  { %p258_p6 = por %p257_p5, %p256_p4 }
   0xd   :  { %p259_p7 = pnand %p258_p6, %p252_p3 }
   0xf   :  { %262 = shalt.err (!%p259_p7)
}
  0x10   :  { %s290_s19 = smov 128   ;;  %s291_s20 = smov 8  }
  0x11   :  { %21 = dma.hbm_to_vmem [thread:$0]  %s373_s1, 256, %s16_s10, [#allocation5], %s290_s19, %s290_s19, %s291_s20  }
  0x12   :  { %285 = dma.done.wait [#allocation5], 256  }
  0x13   :  { %286 = vsyncadd [#allocation5], 4294967040  ;;  %v28_v0 = vlaneseq  ;;  %v35_v4 = vstv %s372_s0  ;;  %v292_v31 = vmov 683565275   ;;  %v293_v33 = vmov 2475754826  }
  0x14   :  { %v294_v35 = vmov 2131351028   ;;  %v295_v42 = vmov 2102212464   ;;  %v296_v45 = vmov 920167782  }
  0x15   :  { %v29_v1 = vshrl.u32 %v28_v0, 7  ;;  %v31_v2 = vand.u32 127, %v28_v0  ;;  %v297_v48 = vmov 1326507024   ;;  %s298_s0 = smov [#allocation7]  }
  0x16   :  { %s198_s1 = sshll.u32 %s298_s0, 4  ;;  %s199_s1 = int_to_ptr.vmem [resolvable:$true] %s198_s1 }
  0x17   :  { %v32_v3 = vmul.u32 128, %v29_v1  ;;  %s263_s25 = scalar_lea.vmem %s199_s1, 256  ;;  %p268_p9 = scmp.lt.s32.totalorder %s199_s1, %s199_s1 }
  0x18   :  { %p264_p8 = scmp.ne.s32.totalorder %s199_s1, %s263_s25  ;;  %p269_p10 = scmp.lt.s32.totalorder %s263_s25, %s263_s25 }
  0x19   :  { %v33_v5 = vadd.s32 %v32_v3, %v31_v2 }
  0x1a   :  { %p270_p11 = por %p269_p10, %p268_p9 }
  0x1b   :  { %v36_v6 = vadd.s32 %v35_v4, %v33_v5 }
  0x1c   :  { %p271_p12 = pnand %p270_p11, %p264_p8 }
  0x1d   :  { %v37_v7 = vshrl.u32 %v36_v6, 16 }
  0x1f   :  { %v38_v8 = vxor.u32 %v37_v7, %v36_v6 }
  0x21   :  { %v39_v9 = vmul.u32 2146121005, %v38_v8 }
  0x23   :  { %v40_v10 = vshrl.u32 %v39_v9, 15 }
  0x25   :  { %v41_v11 = vxor.u32 %v40_v10, %v39_v9 }
  0x27   :  { %v42_v12 = vmul.u32 2221713035, %v41_v11 }
  0x29   :  { %v43_v13 = vshrl.u32 %v42_v12, 16 }
  0x2b   :  { %v44_v14 = vxor.u32 %v43_v13, %v42_v12 }
  0x2d   :  { %v49_v15 = vand.u32 65535, %v44_v14  ;;  %v45_v37 = vshrl.u32 %v44_v14, 16 }
  0x2f   :  { %v50_v16 = vshll.u32 %v49_v15, 7  ;;  %v46_v0 = vshll.u32 %v45_v37, 7 }
  0x31   :  { %v51_v17 = vor.u32 1065353216, %v50_v16  ;;  %v47_v9 = vor.u32 1065353216, %v46_v0 }
  0x33   :  { %v332_v18 = vadd.f32 -1.0, %v51_v17  ;;  %v53_v13 = vsub.f32 2.0, %v47_v9  ;;  %v188_v9 = vld [vmem:[#allocation4 + $0x8] sm:$0xff] }
  0x35   :  { %v335_v19 = vmul.f32 6.2831855, %v332_v18  ;;  %231 = vlog2.f32 %v53_v13 }
  0x37   :  { %v70_v20 = vand.u32 2139095040, %v335_v19  ;;  %v67_v21 = vand.u32 2147483647, %v335_v19  ;;  %vm69_vm7 = vcmp.lt.s32.totalorder %v335_v19, 0  ;;  %vm159_vm14 = vweird.f32 %v335_v19 }
  0x39   :  { %v71_v22 = vshrl.u32 %v70_v20, 23  ;;  %v74_v24 = vand.u32 8388607, %v67_v21  ;;  %vm68_vm8 = vcmp.le.f32.partialorder %v67_v21, 0.7853982 }
  0x3b   :  { %v213_v23 = vadd.s32 4294967169, %v71_v22  ;;  %v75_v26 = vor.u32 8388608, %v74_v24 }
  0x3d   :  { %v77_v25 = vadd.s32 1, %v213_v23  ;;  %v115_v38 = vshll.u32 %v75_v26, 8 }
  0x3f   :  { %vm78_vm0 = vcmp.gt.s32.totalorder %v77_v25, 0  ;;  %v232_v24 = vpop.eup %231 }
  0x40   :  { %v79_v27 = vsel %vm78_vm0, %v77_v25, 0  ;;  %v56_v26 = vmul.f32 0.6931472, %v232_v24 }
  0x41   :  { %v81_v28 = vand.u32 31, %v79_v27  ;;  %v80_v29 = vshrl.u32 %v79_v27, 5 }
  0x43   :  { %v82_v30 = vsub.s32 32, %v81_v28  ;;  %v84_v32 = vshll.u32 %v292_v31, %v81_v28  ;;  %v87_v34 = vshll.u32 %v293_v33, %v81_v28  ;;  %v90_v36 = vshll.u32 %v294_v35, %v81_v28 }
  0x44   :  { %v93_v44 = vshll.u32 %v295_v42, %v81_v28  ;;  %v96_v47 = vshll.u32 %v296_v45, %v81_v28  ;;  %vm99_vm1 = vcmp.lt.s32.totalorder %v80_v29, 1  ;;  %vm100_vm2 = vcmp.lt.s32.totalorder %v80_v29, 2 }
  0x45   :  { %v83_v39 = vshrl.u32 %v292_v31, %v82_v30  ;;  %v85_v40 = vshrl.u32 %v293_v33, %v82_v30  ;;  %v88_v41 = vshrl.u32 %v294_v35, %v82_v30  ;;  %v91_v43 = vshrl.u32 %v295_v42, %v82_v30 }
  0x46   :  { %v94_v46 = vshrl.u32 %v296_v45, %v82_v30  ;;  %v97_v49 = vshrl.u32 %v297_v48, %v82_v30  ;;  %vm101_vm3 = vcmp.lt.s32.totalorder %v80_v29, 3  ;;  %vm102_vm4 = vcmp.lt.s32.totalorder %v80_v29, 4 }
  0x47   :  { %v86_v50 = vor.u32 %v85_v40, %v84_v32  ;;  %v89_v51 = vor.u32 %v88_v41, %v87_v34  ;;  %v92_v52 = vor.u32 %v91_v43, %v90_v36  ;;  %v57_v32 = vmul.f32 -2.0, %v56_v26 }
  0x48   :  { %v95_v53 = vor.u32 %v94_v46, %v93_v44  ;;  %v98_v54 = vor.u32 %v97_v49, %v96_v47 }
  0x49   :  { %v103_v55 = vsel %vm99_vm1, %v83_v39, %v86_v50  ;;  %v107_v56 = vsel %vm99_vm1, %v86_v50, %v89_v51  ;;  %v111_v57 = vsel %vm99_vm1, %v89_v51, %v92_v52  ;;  %v104_v58 = vsel %vm102_vm4, %v92_v52, 2102212464 }
  0x4a   :  { %v108_v59 = vsel %vm102_vm4, %v95_v53, 920167782  ;;  %v112_v60 = vsel %vm102_vm4, %v98_v54, 1326507024  ;;  %v105_v61 = vsel %vm101_vm3, %v89_v51, %v104_v58  ;;  %233 = vrsqrt.f32 %v57_v32 }
  0x4b   :  { %v109_v62 = vsel %vm101_vm3, %v92_v52, %v108_v59  ;;  %v113_v63 = vsel %vm101_vm3, %v95_v53, %v112_v60  ;;  %v106_v1 = vsel %vm100_vm2, %v103_v55, %v105_v61  ;;  %vm60_vm9 = vcmp.eq.f32.partialorder %v57_v32, inf  ;;  %v183_v61 = vld [vmem:[#allocation4] sm:$0xff] }
  0x4c   :  { %v110_v2 = vsel %vm100_vm2, %v107_v56, %v109_v62  ;;  %v114_v3 = vsel %vm100_vm2, %v111_v57, %v113_v63  ;;  %v122_v8 = vmul.u32 %v115_v38, %v106_v1  ;;  %v63_v49 = vand.u32 2147483648, %v57_v32 }
  0x4d   :  { %v341_v4 = vmul.u32.u64.low %v115_v38, %v114_v3  ;;  %v342_v5 = vmul.u32.u64.high %v115_v38, %v114_v3, %v341_v4  ;;  %v344_v6 = vmul.u32.u64.low %v115_v38, %v110_v2  ;;  %v345_v7 = vmul.u32.u64.high %v115_v38, %v110_v2, %v344_v6 }
  0x4e   :  { %vm62_vm10 = vcmp.eq.f32.partialorder %v57_v32, 0.0  ;;  %vm180_vm1 = vcmp.lt.f32.partialorder %v332_v18, 0.5 }
  0x4f   :  { %vm124_vm5 = vc.u32 %v342_v5, %v344_v6  ;;  %v125_v10 = vadd.s32 1, %v345_v7  ;;  %v123_v27 = vadd.s32 %v344_v6, %v342_v5 }
  0x51   :  { %v126_v11 = vsel %vm124_vm5, %v125_v10, %v345_v7 }
  0x52   :  { %v127_v12 = vadd.s32 %v126_v11, %v122_v8 }
  0x54   :  { %v128_v14 = vadd.s32 536870912, %v127_v12  ;;  %v234_v45 = vpop.eup %233 }
  0x55   :  { %v59_v47 = vmul.f32 %v234_v45, %v57_v32 }
  0x56   :  { %v129_v15 = vshrl.u32 %v128_v14, 30 }
  0x57   :  { %v61_v51 = vsel %vm60_vm9, %v57_v32, %v59_v47 }
  0x58   :  { %v130_v16 = vshll.u32 %v129_v15, 30  ;;  %v153_v42 = vsub.s32 4, %v129_v15  ;;  %v64_v53 = vsel %vm62_vm10, %v63_v49, %v61_v51 }
  0x59   :  { %v65_v56 = vmul.f32 0.5, %v64_v53 }
  0x5a   :  { %v131_v17 = vsub.s32 %v127_v12, %v130_v16  ;;  %v154_v46 = vsel %vm69_vm7, %v153_v42, %v129_v15 }
  0x5b   :  { %v156_v48 = vsel %vm68_vm8, 0, %v154_v46 }
  0x5c   :  { %v133_v20 = vsub.s32 0, %v131_v17  ;;  %v160_v50 = vand.u32 3, %v156_v48 }
  0x5e   :  { %v214_v22 = vmin.u32 %v133_v20, %v131_v17  ;;  %vm165_vm11 = vcmp.eq.s32.totalorder %v160_v50, 2  ;;  %vm162_vm12 = vcmp.eq.s32.totalorder %v160_v50, 0  ;;  %vm161_vm13 = vcmp.lt.s32.totalorder %v160_v50, 2 }
  0x60   :  { %v135_v23 = vclz %v214_v22 }
  0x62   :  { %v215_v25 = vadd.s32 4294967294, %v135_v23 }
  0x64   :  { %vm216_vm6 = vcmp.lt.s32.totalorder %v215_v25, 0 }
  0x65   :  { %v138_v28 = vsel %vm216_vm6, 0, %v215_v25 }
  0x66   :  { %v139_v29 = vsub.s32 32, %v138_v28  ;;  %v140_v30 = vshll.u32 %v131_v17, %v138_v28  ;;  %v143_v31 = vsub.s32 4294967266, %v138_v28 }
  0x68   :  { %v141_v33 = vshrl.u32 %v123_v27, %v139_v29  ;;  %v144_v34 = vadd.s32 127, %v143_v31 }
  0x6a   :  { %v142_v35 = vor.u32 %v141_v33, %v140_v30  ;;  %v145_v36 = vshll.u32 %v144_v34, 23 }
  0x6c   :  { %v146_v37 = vor.u32 4788187, %v145_v36  ;;  %v149_v38 = vcvt.s32.f32 %v142_v35 }
  0x6e   :  { %v147_v39 = vand.u32 2147483647, %v146_v37 }
  0x70   :  { %v150_v40 = vmul.f32 %v149_v38, %v147_v39 }
  0x72   :  { %v151_v41 = vxor.u32 2147483648, %v150_v40 }
  0x74   :  { %v152_v43 = vsel %vm69_vm7, %v151_v41, %v150_v40 }
  0x75   :  { %v155_v44 = vsel %vm68_vm8, %v335_v19, %v152_v43 }
  0x76   :  { %235 = vcosq.f32 %v155_v44 }
  0x77   :  { %237 = vsinq.f32 %v155_v44 }
  0x80   :  { %v236_v52 = vpop.eup %235 }
  0x81   :  { %v238_v21 = vpop.eup %237  ;;  %v166_v54 = vxor.u32 2147483648, %v236_v52 }
  0x82   :  { %v163_v55 = vxor.u32 2147483648, %v238_v21 }
  0x83   :  { %v167_v57 = vsel %vm165_vm11, %v166_v54, %v238_v21 }
  0x84   :  { %v164_v58 = vsel %vm162_vm12, %v236_v52, %v163_v55 }
  0x85   :  { %v168_v59 = vsel %vm161_vm13, %v164_v58, %v167_v57 }
  0x86   :  { %v169_v60 = vsel %vm159_vm14, nan, %v168_v59 }
  0x87   :  { %v170_v62 = vmul.f32 %v169_v60, %v169_v60  ;;  %v184_v63 = vmul.f32 %v169_v60, %v65_v56 }
  0x89   :  { %v171_v0 = vsub.f32 1.0, %v170_v62  ;;  %v185_v1 = vadd.f32 %v184_v63, %v183_v61 }
  0x8b   :  { %v172_v2 = vmax.f32 %v171_v0, 0.0  ;;  %186 = vst [vmem:[#allocation7] sm:$0xff] %v185_v1 }
  0x8d   :  { %239 = vrsqrt.f32 %v172_v2  ;;  %vm175_vm15 = vcmp.eq.f32.partialorder %v172_v2, inf  ;;  %v178_v4 = vand.u32 2147483648, %v172_v2  ;;  %vm177_vm0 = vcmp.eq.f32.partialorder %v172_v2, 0.0 }
  0x97   :  { %v240_v3 = vpop.eup %239 }
  0x98   :  { %v174_v5 = vmul.f32 %v240_v3, %v172_v2 }
  0x9a   :  { %v176_v6 = vsel %vm175_vm15, %v172_v2, %v174_v5 }
  0x9b   :  { %v179_v7 = vsel %vm177_vm0, %v178_v4, %v176_v6 }
  0x9c   :  { %v181_v19 = vsub.f32 0.0, %v179_v7 }
  0x9e   :  { %v182_v8 = vsel %vm180_vm1, %v179_v7, %v181_v19 }
  0x9f   :  { %v189_v10 = vmul.f32 %v182_v8, %v65_v56 }
  0xa1   :  { %v190_v11 = vadd.f32 %v189_v10, %v188_v9 }
  0xa3   :  { %192 = vst [vmem:[#allocation7 + $0x8] sm:$0xff] %v190_v11 }
  0xa4   :  { %274 = shalt.err (!%p271_p12)
}
  0xa5   :  { %s275_s28 = scalar_lea.hbm %s374_s2, 256 }
  0xa6   :  { %p276_p13 = scmp.ne.s32.totalorder %s374_s2, %s275_s28  ;;  %p279_p0 = scmp.lt.u32.totalorder %s275_s28, %s374_s2 }
  0xa8   :  { %p281_p1 = pnand %p279_p0, %p276_p13 }
  0xaa   :  { %284 = shalt.err (!%p281_p1)
}
  0xab   :  { %204 = dma.vmem_to_hbm [thread:$0]  %s199_s1, 256, %s374_s2, [#allocation6], %s290_s19, %s290_s19, %s291_s20  }
  0xac   :  { %287 = dma.done.wait [#allocation6], 256  }
  0xad   :  { %288 = vsyncadd [#allocation6], 4294967040 }
  0xae   :  { %208 = vsyncpa [#allocation5], 1 }
  0xaf   :  { %209 = vsyncpa [#allocation6], 1 }

</bundles_post_ra>
